<compile_context>
chip_gen: v7x
topology: tpu7x:2x2x1
jax: 0.10.0
libtpu: 0.0.40
codegen_flags: <defaults>
</compile_context>

<pallas_src>
import functools
import math

import jax
import jax.numpy as jnp
from jax.experimental import pallas as pl
from jax.experimental.pallas import tpu as pltpu

NF = 128                       # num_features
_SELU_ALPHA = 1.6732632423543772
_SELU_SCALE = 1.0507009873554805
_IMAGENET_MEAN = (0.485, 0.456, 0.406)
_IMAGENET_STD = (0.229, 0.224, 0.225)


def _round_up(v, m):
    return ((v + m - 1) // m) * m


def _pad2(x, r, c):
    if x.shape == (r, c):
        return x
    return jnp.pad(x, ((0, r - x.shape[0]), (0, c - x.shape[1])))


# ---------------------------------------------------------------------------
# Pallas kernels
# ---------------------------------------------------------------------------
def _apply_act(y, act):
    if act == "relu":
        return jnp.maximum(y, 0.0)
    if act == "selu":
        return _SELU_SCALE * jnp.where(y > 0, y, _SELU_ALPHA * (jnp.exp(y) - 1.0))
    if act == "sigmoid":
        return jax.nn.sigmoid(y)
    return y


def _mm_single_kernel(x_ref, w_ref, b_ref, o_ref, *, act):
    y = jnp.dot(x_ref[...], w_ref[...], preferred_element_type=jnp.float32)
    o_ref[...] = _apply_act(y + b_ref[...], act).astype(o_ref.dtype)


def _mm_single_res_kernel(x_ref, w_ref, b_ref, r_ref, o_ref, *, act):
    y = jnp.dot(x_ref[...], w_ref[...], preferred_element_type=jnp.float32)
    o_ref[...] = (_apply_act(y + b_ref[...], act) + r_ref[...]).astype(o_ref.dtype)


def _mm_multi_kernel(x_ref, w_ref, b_ref, o_ref, *, act):
    # Accumulate directly into the resident f32 output block (no VMEM scratch).
    @pl.when(pl.program_id(2) == 0)
    def _():
        o_ref[...] = jnp.zeros_like(o_ref)

    o_ref[...] += jnp.dot(x_ref[...], w_ref[...],
                          preferred_element_type=jnp.float32)

    @pl.when(pl.program_id(2) == pl.num_programs(2) - 1)
    def _():
        o_ref[...] = _apply_act(o_ref[...] + b_ref[...], act)


def pallas_matmul(x, w, b, act="none", residual=None,
                  tm_max=512, tn_max=256, tk_max=512):
    """(M,K)@(K,N)+b with fused activation (and optional fused residual add).

    bf16 MXU inputs / f32 accumulation; the bf16 cast is skipped when the
    caller already provides bf16 (im2col patches are built in bf16); adaptive
    tk; the k grid axis is dropped when one K tile suffices; f32 accumulation
    happens in the resident output block (no scratch)."""
    M, K = x.shape
    K2, N = w.shape
    assert K == K2
    Kp = _round_up(K, 128)
    if Kp <= tk_max:
        tk = Kp
    else:
        tk = next(c for c in (512, 384, 256, 128) if Kp % c == 0)
    Np = _round_up(N, 128)
    tn = Np if Np <= tn_max else (256 if Np % 256 == 0 else 128)
    Mp = _round_up(M, 16)
    if Mp <= tm_max:
        tm = Mp
    elif Mp % 512 == 0 and tm_max >= 512:
        tm = 512
    elif Mp % 256 == 0:
        tm = 256
    elif Mp % 128 == 0:
        tm = 128
    else:
        tm = tm_max
        Mp = _round_up(Mp, tm)

    xp = _pad2(x, Mp, Kp)
    if xp.dtype != jnp.bfloat16:
        xp = xp.astype(jnp.bfloat16)
    wp = _pad2(w, Kp, Np)
    if wp.dtype != jnp.bfloat16:
        wp = wp.astype(jnp.bfloat16)
    bp = _pad2(b.astype(jnp.float32).reshape(1, N), 1, Np)
    nk = Kp // tk

    bytes_acc = Mp * Kp * 2 + Kp * Np * 2 + Mp * Np * 4
    if residual is not None:
        bytes_acc += Mp * Np * 4
    cost = pl.CostEstimate(
        flops=2 * Mp * Kp * Np,
        transcendentals=Mp * Np if act in ("selu", "sigmoid") else 0,
        bytes_accessed=bytes_acc)

    if nk == 1:
        in_specs = [pl.BlockSpec((tm, tk), lambda i, j: (i, 0)),
                    pl.BlockSpec((tk, tn), lambda i, j: (0, j)),
                    pl.BlockSpec((1, tn), lambda i, j: (0, j))]
        args = [xp, wp, bp]
        if residual is not None:
            in_specs.append(pl.BlockSpec((tm, tn), lambda i, j: (i, j)))
            args.append(_pad2(residual.astype(jnp.float32), Mp, Np))
            kern = functools.partial(_mm_single_res_kernel, act=act)
        else:
            kern = functools.partial(_mm_single_kernel, act=act)
        out = pl.pallas_call(
            kern,
            out_shape=jax.ShapeDtypeStruct((Mp, Np), jnp.float32),
            grid_spec=pltpu.PrefetchScalarGridSpec(
                num_scalar_prefetch=0, grid=(Mp // tm, Np // tn),
                in_specs=in_specs,
                out_specs=pl.BlockSpec((tm, tn), lambda i, j: (i, j))),
            compiler_params=pltpu.CompilerParams(
                dimension_semantics=("parallel", "parallel")),
            cost_estimate=cost,
        )(*args)
    else:
        assert residual is None
        out = pl.pallas_call(
            functools.partial(_mm_multi_kernel, act=act),
            out_shape=jax.ShapeDtypeStruct((Mp, Np), jnp.float32),
            grid_spec=pltpu.PrefetchScalarGridSpec(
                num_scalar_prefetch=0, grid=(Mp // tm, Np // tn, nk),
                in_specs=[pl.BlockSpec((tm, tk), lambda i, j, k: (i, k)),
                          pl.BlockSpec((tk, tn), lambda i, j, k: (k, j)),
                          pl.BlockSpec((1, tn), lambda i, j, k: (0, j))],
                out_specs=pl.BlockSpec((tm, tn), lambda i, j, k: (i, j))),
            compiler_params=pltpu.CompilerParams(
                dimension_semantics=("parallel", "parallel", "arbitrary")),
            cost_estimate=cost,
        )(xp, wp, bp)
    if (Mp, Np) != (M, N):
        out = out[:M, :N]
    return out


def _attconv_combine_kernel(x_ref, w_ref, b_ref, d1_ref, d2_ref, d3_ref,
                            d4_ref, o_ref, *, C):
    """1x1 conv (C->4C) epilogue-fused with group softmax + weighted combine."""
    att = jnp.dot(x_ref[...], w_ref[...],
                  preferred_element_type=jnp.float32) + b_ref[...]
    a0 = att[:, 0 * C:1 * C]
    a1 = att[:, 1 * C:2 * C]
    a2 = att[:, 2 * C:3 * C]
    a3 = att[:, 3 * C:4 * C]
    m = jnp.maximum(jnp.maximum(a0, a1), jnp.maximum(a2, a3))
    e0 = jnp.exp(a0 - m)
    e1 = jnp.exp(a1 - m)
    e2 = jnp.exp(a2 - m)
    e3 = jnp.exp(a3 - m)
    inv = pl.reciprocal(e0 + e1 + e2 + e3, approx=True)
    o_ref[...] = (d1_ref[...] * e0 + d2_ref[...] * e1 +
                  d3_ref[...] * e2 + d4_ref[...] * e3) * inv


def attention_conv_combine(y_nhwc, cp, d_flats, C):
    """Fused: att = 1x1 conv (C -> 4C) + softmax over 4 groups + weighted
    combine with down1..4.  Avoids writing/re-reading the (M,4C) f32 att."""
    n, h, w, cin = y_nhwc.shape
    M = n * h * w
    x = y_nhwc.reshape(M, cin).astype(jnp.bfloat16)
    N = 4 * C
    tm = min(512, _round_up(M, 8))
    Mp = _round_up(M, tm)

    def padr(v):
        return v if v.shape[0] == Mp else jnp.pad(v, ((0, Mp - v.shape[0]), (0, 0)))

    bp = cp["b"].astype(jnp.float32).reshape(1, N)
    cost = pl.CostEstimate(flops=2 * Mp * cin * N + 12 * Mp * C,
                           transcendentals=4 * Mp * C,
                           bytes_accessed=Mp * cin * 2 + cin * N * 2 + 5 * Mp * C * 4)
    out = pl.pallas_call(
        functools.partial(_attconv_combine_kernel, C=C),
        out_shape=jax.ShapeDtypeStruct((Mp, C), jnp.float32),
        grid_spec=pltpu.PrefetchScalarGridSpec(
            num_scalar_prefetch=0, grid=(Mp // tm,),
            in_specs=[pl.BlockSpec((tm, cin), lambda i: (i, 0)),
                      pl.BlockSpec((cin, N), lambda i: (0, 0)),
                      pl.BlockSpec((1, N), lambda i: (0, 0))] +
                     [pl.BlockSpec((tm, C), lambda i: (i, 0))] * 4,
            out_specs=pl.BlockSpec((tm, C), lambda i: (i, 0))),
        compiler_params=pltpu.CompilerParams(dimension_semantics=("parallel",)),
        cost_estimate=cost,
    )(padr(x), cp["wm"], bp, *[padr(d) for d in d_flats])
    return out[:M]


def _gap_kernel(x_ref, o_ref, *, inv_count):
    @pl.when(pl.program_id(1) == 0)
    def _():
        o_ref[...] = jnp.zeros_like(o_ref)
    o_ref[...] += jnp.sum(x_ref[...], axis=1, keepdims=True) * inv_count


def pallas_gap(f):
    """Global average pool, NHWC (n,h,w,C) -> (n,C) lane-dense channel output."""
    n, h, w, C = f.shape
    HW = h * w
    x = f.reshape(n, HW, C)
    THW = min(512, _round_up(HW, 8))
    HWp = _round_up(HW, THW)
    if HWp != HW:
        x = jnp.pad(x, ((0, 0), (0, HWp - HW), (0, 0)))
    out = pl.pallas_call(
        functools.partial(_gap_kernel, inv_count=1.0 / float(HW)),
        out_shape=jax.ShapeDtypeStruct((n, 1, C), jnp.float32),
        grid_spec=pltpu.PrefetchScalarGridSpec(
            num_scalar_prefetch=0, grid=(n, HWp // THW),
            in_specs=[pl.BlockSpec((1, THW, C), lambda i, j: (i, j, 0))],
            out_specs=pl.BlockSpec((1, 1, C), lambda i, j: (i, 0, 0))),
        compiler_params=pltpu.CompilerParams(
            dimension_semantics=("parallel", "arbitrary")),
    )(x)
    return out.reshape(n, C)


def _a_branch_kernel(x_ref, w1_ref, b1_ref, w2_ref, b2_ref, w3_ref, b3_ref, o_ref):
    y = _apply_act(jnp.dot(x_ref[...], w1_ref[...],
                           preferred_element_type=jnp.float32) + b1_ref[...], "selu")
    y = _apply_act(jnp.dot(y.astype(jnp.bfloat16), w2_ref[...],
                           preferred_element_type=jnp.float32) + b2_ref[...], "selu")
    y = _apply_act(jnp.dot(y.astype(jnp.bfloat16), w3_ref[...],
                           preferred_element_type=jnp.float32) + b3_ref[...], "sigmoid")
    o_ref[...] = y


def a_branch(f, p):
    """Global average pool + the three tiny 1x1 convs fused in one pallas_call."""
    pooled = pallas_gap(f)                                      # (n, C)
    n, C = pooled.shape
    np_ = _round_up(max(n, 8), 8)
    xp = _pad2(pooled, np_, C).astype(jnp.bfloat16)
    l0, l1, l2 = p["a"]
    w3 = _pad2(l2["wm"], C, 128)                                 # (C,1)->(C,128) bf16
    b3 = jnp.pad(l2["b"], (0, 128 - l2["b"].shape[0])).reshape(1, 128)
    out = pl.pallas_call(
        _a_branch_kernel,
        out_shape=jax.ShapeDtypeStruct((np_, 128), jnp.float32),
        grid_spec=pltpu.PrefetchScalarGridSpec(
            num_scalar_prefetch=0, grid=(1,),
            in_specs=[pl.BlockSpec((np_, C), lambda i: (0, 0)),
                      pl.BlockSpec((C, C), lambda i: (0, 0)),
                      pl.BlockSpec((1, C), lambda i: (0, 0)),
                      pl.BlockSpec((C, C), lambda i: (0, 0)),
                      pl.BlockSpec((1, C), lambda i: (0, 0)),
                      pl.BlockSpec((C, 128), lambda i: (0, 0)),
                      pl.BlockSpec((1, 128), lambda i: (0, 0))],
            out_specs=pl.BlockSpec((np_, 128), lambda i: (0, 0))),
        compiler_params=pltpu.CompilerParams(dimension_semantics=("arbitrary",)),
    )(xp, l0["wm"], l0["b"].reshape(1, C), l1["wm"], l1["b"].reshape(1, C), w3, b3)
    return out[:n, :1]                                           # (n, 1)


def _final_fusion_kernel(x0_ref, x_ref, t_ref, a1mt_ref, r1_ref, r2_ref, r3_ref,
                         r4_ref, xj5_ref, attf_ref, o_ref):
    """Lane-dense final fusion, one image per grid step (rows = channels,
    lanes = pixels).  attf groups are padded to 8 rows for sublane alignment."""
    eps = 1e-8
    x0 = x0_ref[0]                           # (3, TC)
    x = x_ref[0]                             # (3, TC)
    t = t_ref[0]                             # (1, TC)
    a1mt = a1mt_ref[0]                       # (1, TC)  == a * (1 - t)
    log_x0 = jnp.log(jnp.maximum(x0, eps))
    llxi = jnp.log(jnp.log(1.0 / jnp.clip(x0, eps, 1.0 - eps)))
    x_phy = jnp.clip((x0 - a1mt) / jnp.maximum(t, eps), 0.0, 1.0)
    x_j1 = jnp.clip(jnp.exp(log_x0 + r1_ref[0]), 0.0, 1.0)
    r2 = r2_ref[0]
    x_j2 = jnp.concatenate(
        [jnp.clip((x[c:c + 1, :] + r2[c:c + 1, :]) * _IMAGENET_STD[c]
                  + _IMAGENET_MEAN[c], 0.0, 1.0) for c in range(3)], axis=0)
    x_j3 = jnp.clip(jnp.exp(-jnp.exp(llxi + r3_ref[0])), 0.0, 1.0)
    v4 = log_x0 + r4_ref[0]
    # stable softplus == log(1 + exp(v4)); identical post-clip to torch
    x_j4 = jnp.clip(jnp.maximum(v4, 0.0) +
                    jnp.log(1.0 + jnp.exp(-jnp.abs(v4))), 0.0, 1.0)
    x_j5 = xj5_ref[0]
    cands = (x_phy, x_j1, x_j2, x_j3, x_j4, x_j5)
    attf = attf_ref[0]                       # (24, TC): 3 groups of 8 rows
    rows = []
    for c in range(3):
        wgt = attf[8 * c:8 * c + 6, :]       # (6, TC)
        m = jnp.max(wgt, axis=0, keepdims=True)
        e = jnp.exp(wgt - m)
        s = jnp.sum(e, axis=0, keepdims=True)
        val = jnp.zeros_like(s)
        for k in range(6):
            val = val + e[k:k + 1, :] * cands[k][c:c + 1, :]
        rows.append(jnp.clip(val * pl.reciprocal(s, approx=True), 0.0, 1.0))
    o_ref[0] = jnp.concatenate(rows, axis=0)


def final_fusion(x0_3d, x_3d, t_3d, a1mt_3d, r_3ds, xj5_3d, attf_3d, n, P):
    Pp = _round_up(P, 128)
    TC = min(1024, Pp)
    Pp = _round_up(Pp, TC)

    def padl(v):
        if v.shape[-1] == Pp:
            return v
        return jnp.pad(v, ((0, 0), (0, 0), (0, Pp - v.shape[-1])))

    def spec(rows):
        return pl.BlockSpec((1, rows, TC), lambda i, j: (i, 0, j))

    args = ([padl(x0_3d), padl(x_3d), padl(t_3d), padl(a1mt_3d)] +
            [padl(r) for r in r_3ds] + [padl(xj5_3d), padl(attf_3d)])
    in_specs = [spec(3), spec(3), spec(1), spec(1)] + [spec(3)] * 4 + \
               [spec(3), spec(24)]
    cost = pl.CostEstimate(flops=120 * n * Pp, transcendentals=30 * n * Pp,
                           bytes_accessed=53 * n * Pp * 4)
    out = pl.pallas_call(
        _final_fusion_kernel,
        out_shape=jax.ShapeDtypeStruct((n, 3, Pp), jnp.float32),
        grid_spec=pltpu.PrefetchScalarGridSpec(
            num_scalar_prefetch=0, grid=(n, Pp // TC),
            in_specs=in_specs, out_specs=spec(3)),
        compiler_params=pltpu.CompilerParams(
            dimension_semantics=("parallel", "parallel")),
        cost_estimate=cost,
    )(*args)
    return out[:, :, :P]


# ---------------------------------------------------------------------------
# Glue (layout plumbing, im2col, bilinear resize)
# ---------------------------------------------------------------------------
def conv2d(x, cp, stride=1, padding=0, act="none", residual=None):
    """NHWC conv via channel-last im2col (built in bf16) + Pallas bf16 matmul.
    # TODO(synk): fully fusing the kh*kw taps onto the matmul reduction grid
    # axis (shifted BlockSpec windows on the padded NHWC input) would remove
    # the im2col materialization entirely; kept as XLA slicing+concat here.
    """
    n, H, W, cin = x.shape
    kh, kw = cp["kh"], cp["kw"]
    cout = cp["wm"].shape[1]
    Ho = (H + 2 * padding - kh) // stride + 1
    Wo = (W + 2 * padding - kw) // stride + 1
    xb = x.astype(jnp.bfloat16)          # cast once BEFORE im2col -> bf16 patches
    if kh == 1 and kw == 1 and stride == 1 and padding == 0:
        patches = xb.reshape(n * H * W, cin)
    else:
        xp = jnp.pad(xb, ((0, 0), (padding, padding), (padding, padding), (0, 0)))
        cols = [xp[:, i:i + stride * (Ho - 1) + 1:stride,
                   j:j + stride * (Wo - 1) + 1:stride, :]
                for i in range(kh) for j in range(kw)]
        patches = jnp.concatenate(cols, axis=-1).reshape(n * Ho * Wo, kh * kw * cin)
    res_f = None if residual is None else residual.reshape(n * Ho * Wo, cout)
    y = pallas_matmul(patches, cp["wm"], cp["b"], act=act, residual=res_f)
    return y.reshape(n, Ho, Wo, cout)


def resize_nhwc(x, h, w):
    n, _, _, c = x.shape
    return jax.image.resize(x, (n, h, w, c), method="bilinear")


def head_to_3d(y, H, W):
    """NHWC low-res head -> bilinear upsample -> (n, c, H*W) per-image rows."""
    n, h, w, c = y.shape
    y = jnp.transpose(y, (0, 3, 1, 2))          # tiny transpose at low res
    y = jax.image.resize(y, (n, c, H, W), method="bilinear")
    return y.reshape(n, c, H * W)


# ---------------------------------------------------------------------------
# Parameter init (deterministic, synthetic)
# ---------------------------------------------------------------------------
class KeyGen:
    def __init__(self, seed):
        self.key = jax.random.PRNGKey(seed)

    def __call__(self):
        self.key, sub = jax.random.split(self.key)
        return sub


def conv_param(kg, cout, cin, k):
    std = 0.5 / math.sqrt(cin * k * k)
    w4 = jax.random.normal(kg(), (cout, cin, k, k), jnp.float32) * std
    # pre-flatten (HWIO) + pre-cast to bf16 once at init: weights are reused
    # every forward, so no per-call transpose/cast is needed.
    wm = jnp.transpose(w4, (2, 3, 1, 0)).reshape(k * k * cin, cout)
    return {"wm": wm.astype(jnp.bfloat16), "b": jnp.zeros((cout,), jnp.float32),
            "kh": k, "kw": k}


def init_params(seed=0, nf=NF):
    kg = KeyGen(seed)
    p = {
        "mean": jnp.array(_IMAGENET_MEAN, jnp.float32).reshape(1, 3, 1, 1),
        "std": jnp.array(_IMAGENET_STD, jnp.float32).reshape(1, 3, 1, 1),
        # TODO(synk): pretrained ResNeXt101 backbone replaced by a deterministic
        #             strided-conv stand-in with matching feature-pyramid shapes
        #             (256/512/1024/2048 channels at strides 4/8/16/32).
        "stem": conv_param(kg, 64, 3, 3),
        "l1": conv_param(kg, 256, 64, 3),
        "l2": conv_param(kg, 512, 256, 1),
        "l3": conv_param(kg, 1024, 512, 1),
        "l4": conv_param(kg, 2048, 1024, 1),
        "down1": conv_param(kg, nf, 256, 1),
        "down2": conv_param(kg, nf, 512, 1),
        "down3": conv_param(kg, nf, 1024, 1),
        "down4": conv_param(kg, nf, 2048, 1),
        "t": [conv_param(kg, nf // 2, nf, 3), conv_param(kg, 1, nf // 2, 1)],
        "a": [conv_param(kg, nf, nf, 1), conv_param(kg, nf, nf, 1),
              conv_param(kg, 1, nf, 1)],
        "refine": [conv_param(kg, nf, nf, 3), conv_param(kg, nf, nf, 3),
                   conv_param(kg, nf, nf, 1)],
        "att_fusion": [conv_param(kg, nf, nf * 4, 1),
                       conv_param(kg, nf // 2, nf, 3),
                       conv_param(kg, nf // 2, nf // 2, 3),
                       conv_param(kg, 18, nf // 2, 1)],
    }
    # Layer-0 of the six attention branches batched into one weight (the six
    # branches share the same im2col(concat) input -> one matmul, N = 6*nf).
    att0 = [conv_param(kg, nf, nf * 4, 3) for _ in range(6)]
    p["att_l0"] = {"wm": jnp.concatenate([c["wm"] for c in att0], axis=1),
                   "b": jnp.concatenate([c["b"] for c in att0]),
                   "kh": 3, "kw": 3}
    for name in ("att_phy", "att1", "att2", "att3", "att4", "att5"):
        p[name] = [conv_param(kg, nf, nf, 3),          # layer-1 3x3 (per branch)
                   conv_param(kg, nf * 4, nf, 1)]      # layer-2 1x1 (fused combine)
    for name in ("j1", "j2", "j3", "j4", "j5"):
        p[name] = [conv_param(kg, nf // 2, nf, 3), conv_param(kg, 3, nf // 2, 1)]
    return p


# ---------------------------------------------------------------------------
# Sub-module forwards
# ---------------------------------------------------------------------------
def two_layer_head(f, layers, last_act):
    y = conv2d(f, layers[0], padding=1, act="selu")
    return conv2d(y, layers[1], act=last_act)


def forward(p, x0):
    n, _, H, W = x0.shape
    P = H * W
    x_nchw = (x0 - p["mean"]) / p["std"]
    x = jnp.transpose(x_nchw, (0, 2, 3, 1))                     # NHWC

    # --- backbone stand-in --------------------------------------------------
    l0 = conv2d(x, p["stem"], stride=4, padding=1, act="relu")
    l1 = conv2d(l0, p["l1"], stride=1, padding=1, act="relu")
    l2 = conv2d(l1, p["l2"], stride=2, act="relu")
    l3 = conv2d(l2, p["l3"], stride=2, act="relu")
    l4 = conv2d(l3, p["l4"], stride=2, act="relu")

    down1 = conv2d(l1, p["down1"], act="selu")
    down2 = conv2d(l2, p["down2"], act="selu")
    down3 = conv2d(l3, p["down3"], act="selu")
    down4 = conv2d(l4, p["down4"], act="selu")

    h, w = down1.shape[1], down1.shape[2]
    down2 = resize_nhwc(down2, h, w)
    down3 = resize_nhwc(down3, h, w)
    down4 = resize_nhwc(down4, h, w)
    concat = jnp.concatenate([down1, down2, down3, down4], axis=-1)
    C = down1.shape[-1]
    M = n * h * w
    d_flat = [d.reshape(M, C) for d in (down1, down2, down3, down4)]

    # (1) six attention layer-0 3x3 convs as ONE matmul over shared im2col
    att0_all = conv2d(concat, p["att_l0"], padding=1, act="selu")   # (n,h,w,6C)

    att_names = ("att_phy", "att1", "att2", "att3", "att4", "att5")
    f_list = []
    for bi, name in enumerate(att_names):
        y0 = att0_all[..., bi * C:(bi + 1) * C]
        y1 = conv2d(y0, p[name][0], padding=1, act="selu")
        # (2) final 1x1 conv + softmax + combine with down1..4 fused
        f = attention_conv_combine(y1, p[name][1], d_flat, C)       # (M, C)
        f_list.append(f.reshape(n, h, w, C))

    # (3) refine has shared weights -> batch all six branch features along N
    f_all = jnp.concatenate(f_list, axis=0)                         # (6n,h,w,C)
    r = conv2d(f_all, p["refine"][0], padding=1, act="selu")
    r = conv2d(r, p["refine"][1], padding=1, act="selu")
    f_all = conv2d(r, p["refine"][2], act="none", residual=f_all)   # refine + f
    f_phy, f1, f2, f3, f4, f5 = [f_all[k * n:(k + 1) * n] for k in range(6)]

    a = a_branch(f_phy, p)                                                 # (n,1)
    t_3d = head_to_3d(two_layer_head(f_phy, p["t"], "sigmoid"), H, W)      # (n,1,P)
    r1 = head_to_3d(two_layer_head(f1, p["j1"], "none"), H, W)             # (n,3,P)
    r2 = head_to_3d(two_layer_head(f2, p["j2"], "none"), H, W)
    r3 = head_to_3d(two_layer_head(f3, p["j3"], "none"), H, W)
    r4 = head_to_3d(two_layer_head(f4, p["j4"], "none"), H, W)
    r5 = head_to_3d(two_layer_head(f5, p["j5"], "none"), H, W)

    af = p["att_fusion"]
    attf = conv2d(concat, af[0], act="selu")
    attf = conv2d(attf, af[1], padding=1, act="selu")
    attf = conv2d(attf, af[2], padding=1, act="selu")
    attf = conv2d(attf, af[3], act="none")
    attf_3d = head_to_3d(attf, H, W)                                       # (n,18,P)
    # pad each 6-candidate softmax group to 8 rows (sublane aligned) -> (n,24,P)
    attf_3d = jnp.pad(attf_3d.reshape(n, 3, 6, P),
                      ((0, 0), (0, 0), (0, 2), (0, 0))).reshape(n, 24, P)

    x0_3d = x0.reshape(n, 3, P)
    x_3d = x_nchw.reshape(n, 3, P)
    # TODO(synk): no guaranteed Mosaic lowering for arctan; the x_j5 candidate
    #             is computed in XLA glue and streamed into the fusion kernel.
    xj5_3d = (jnp.arctan(x0_3d + r5) + jnp.pi / 2.0) / jnp.pi
    a1mt_3d = a.reshape(n, 1, 1) * (1.0 - t_3d)                    # a * (1 - t)

    out = final_fusion(x0_3d, x_3d, t_3d, a1mt_3d,
                       [r1, r2, r3, r4], xj5_3d, attf_3d, n, P)
    return out.reshape(n, 3, H, W)                                 # eval-mode output


# ---------------------------------------------------------------------------
if __name__ == "__main__":
    params = init_params(seed=0)
    x0 = jax.random.uniform(jax.random.PRNGKey(0), (2, 3, 32, 32),
                            dtype=jnp.float32)
    out = forward(params, x0)
    out = jax.block_until_ready(out)
    assert out.shape == (2, 3, 32, 32)
    assert bool(jnp.all(jnp.isfinite(out)))
    print("KERNEL_OK")
</pallas_src>

<mosaic_0001>
module attributes {stable_mosaic.version = 11 : i64} {
  func.func @_mm_single_kernel(%arg0: i32, %arg1: i32, %arg2: memref<128x128xbf16, #tpu.memory_space<vmem>>, %arg3: memref<128x128xbf16, #tpu.memory_space<vmem>>, %arg4: memref<1x128xf32, #tpu.memory_space<vmem>>, %arg5: memref<128x128xf32, #tpu.memory_space<vmem>>) attributes {dimension_semantics = [#tpu.dimension_semantics<parallel>, #tpu.dimension_semantics<parallel>], iteration_bounds = array<i64: 1, 1>, scalar_prefetch = 0 : i64, scratch_operands = 0 : i64, tpu.core_type = #tpu.core_type<tc>, window_params = [{transform_indices = @transform_0, window_bounds = array<i64: 128, 128>}, {transform_indices = @transform_1, window_bounds = array<i64: 128, 128>}, {transform_indices = @transform_2, window_bounds = array<i64: 1, 128>}, {transform_indices = @transform_3, window_bounds = array<i64: 128, 128>}]} {
    %c0 = arith.constant 0 : index
    %c0_0 = arith.constant 0 : index
    %0 = vector.load %arg2[%c0, %c0_0] : memref<128x128xbf16, #tpu.memory_space<vmem>>, vector<128x128xbf16>
    %c0_1 = arith.constant 0 : index
    %c0_2 = arith.constant 0 : index
    %1 = vector.load %arg3[%c0_1, %c0_2] : memref<128x128xbf16, #tpu.memory_space<vmem>>, vector<128x128xbf16>
    %cst = arith.constant dense<0.000000e+00> : vector<128x128xf32>
    %2 = tpu.matmul %0, %1, %cst {dimension_numbers = #tpu.dot_dimension_numbers<[1], [0], [0], [1], [0, 0, 1, 1], [], []>} : vector<128x128xbf16>, vector<128x128xbf16>, vector<128x128xf32> -> vector<128x128xf32>
    %c0_3 = arith.constant 0 : index
    %c0_4 = arith.constant 0 : index
    %3 = vector.load %arg4[%c0_3, %c0_4] : memref<1x128xf32, #tpu.memory_space<vmem>>, vector<1x128xf32>
    %4 = vector.broadcast %3 : vector<1x128xf32> to vector<128x128xf32>
    %5 = arith.addf %2, %4 : vector<128x128xf32>
    %cst_5 = arith.constant 0.000000e+00 : f32
    %6 = vector.broadcast %cst_5 : f32 to vector<128x128xf32>
    %7 = arith.maximumf %5, %6 : vector<128x128xf32>
    %c0_6 = arith.constant 0 : index
    %c0_7 = arith.constant 0 : index
    %8 = vector.load %arg5[%c0_6, %c0_7] : memref<128x128xf32, #tpu.memory_space<vmem>>, vector<128x128xf32>
    tpu.vector_store %arg5[%c0_6, %c0_7], %7 {strides = array<i32>} : memref<128x128xf32, #tpu.memory_space<vmem>>, vector<128x128xf32>,
    return
  }
  func.func @transform_0(%arg0: i32, %arg1: i32) -> (i32, i32) {
    %c0_i32 = arith.constant 0 : i32
    %c0_i32_0 = arith.constant 0 : i32
    return %arg0, %c0_i32 : i32, i32
  }
  func.func @transform_1(%arg0: i32, %arg1: i32) -> (i32, i32) {
    %c0_i32 = arith.constant 0 : i32
    %c0_i32_0 = arith.constant 0 : i32
    return %c0_i32, %arg1 : i32, i32
  }
  func.func @transform_2(%arg0: i32, %arg1: i32) -> (i32, i32) {
    %c0_i32 = arith.constant 0 : i32
    %c0_i32_0 = arith.constant 0 : i32
    return %c0_i32, %arg1 : i32, i32
  }
  func.func @transform_3(%arg0: i32, %arg1: i32) -> (i32, i32) {
    %c0_i32 = arith.constant 0 : i32
    return %arg0, %arg1 : i32, i32
  }
}

</mosaic_0001>

<bundles_post_ra>
// kernel: tpu_custom_call.1
= control target key start
LH: loop header
LB: loop body
LE: loop exit
PB: predicated region body
PF: predicated region fallthrough
CT: control target
= control target key end

     0   :  { %8 = vsyncpa [#allocation3], 0  ;;  %s568_s0 = inlined_call_operand.hbm [shape: bf16[128,128], index: 0, kind: input, shape index: {}]   ;;  %s569_s1 = inlined_call_operand.hbm [shape: bf16[128,128], index: 1, kind: input, shape index: {}]   ;;  %s570_s2 = inlined_call_operand.vmem [shape: f32[1,128], index: 2, kind: input, shape index: {}]   ;;  %s571_s3 = inlined_call_operand.hbm [shape: f32[128,128], index: 3, kind: output, shape index: {}]  }
   0x1   :  { %9 = vsyncpa [#allocation6], 0 }
   0x2   :  { %10 = vsyncpa [#allocation4], 0  ;;  %s502_s12 = smov [#allocation2]   ;;  %s430_s16 = scalar_lea.hbm %s568_s0, 1024 }
   0x3   :  { %s16_s13 = sshll.u32 %s502_s12, 4  ;;  %p431_p0 = scmp.ne.s32.totalorder %s568_s0, %s430_s16  ;;  %s17_s13 = int_to_ptr.vmem [resolvable:$true] %s16_s13 }
   0x4   :  { %p434_p1 = scmp.lt.u32.totalorder %s430_s16, %s568_s0 }
   0x6   :  { %p436_p2 = pnand %p434_p1, %p431_p0 }
   0x8   :  { %439 = shalt.err (!%p436_p2)
}
   0x9   :  { %s440_s21 = scalar_lea.vmem %s17_s13, 1024  ;;  %p445_p4 = scmp.lt.s32.totalorder %s17_s13, %s17_s13 }
   0xa   :  { %p441_p3 = scmp.ne.s32.totalorder %s17_s13, %s440_s21  ;;  %p446_p5 = scmp.lt.s32.totalorder %s440_s21, %s440_s21 }
   0xc   :  { %p447_p6 = por %p446_p5, %p445_p4 }
   0xe   :  { %p448_p7 = pnand %p447_p6, %p441_p3 }
  0x10   :  { %451 = shalt.err (!%p448_p7)
}
  0x11   :  { %s503_s22 = smov 64   ;;  %s504_s23 = smov 4  }
  0x12   :  { %22 = dma.hbm_to_vmem [thread:$0]  %s568_s0, 1024, %s17_s13, [#allocation3], %s503_s22, %s503_s22, %s504_s23  }
  0x13   :  { %s505_s26 = smov [#allocation5]   ;;  %s452_s30 = scalar_lea.hbm %s569_s1, 1024 }
  0x14   :  { %s28_s27 = sshll.u32 %s505_s26, 4  ;;  %p453_p8 = scmp.ne.s32.totalorder %s569_s1, %s452_s30  ;;  %s29_s27 = int_to_ptr.vmem [resolvable:$true] %s28_s27 }
  0x15   :  { %p456_p9 = scmp.lt.u32.totalorder %s452_s30, %s569_s1 }
  0x17   :  { %p458_p10 = pnand %p456_p9, %p453_p8 }
  0x19   :  { %461 = shalt.err (!%p458_p10)
}
  0x1a   :  { %s462_s8 = scalar_lea.vmem %s29_s27, 1024  ;;  %p467_p12 = scmp.lt.s32.totalorder %s29_s27, %s29_s27 }
  0x1b   :  { %p463_p11 = scmp.ne.s32.totalorder %s29_s27, %s462_s8  ;;  %p468_p13 = scmp.lt.s32.totalorder %s462_s8, %s462_s8 }
  0x1d   :  { %p469_p0 = por %p468_p13, %p467_p12 }
  0x1f   :  { %p470_p1 = pnand %p469_p0, %p463_p11 }
  0x21   :  { %473 = shalt.err (!%p470_p1)
}
  0x22   :  { %34 = dma.hbm_to_vmem [thread:$0]  %s569_s1, 1024, %s29_s27, [#allocation6], %s503_s22, %s503_s22, %s504_s23  }
  0x23   :  { %496 = dma.done.wait [#allocation3], 1024  }
  0x24   :  { %497 = vsyncadd [#allocation3], 4294966272 }
  0x25   :  { %498 = dma.done.wait [#allocation6], 1024  }
  0x26   :  { %499 = vsyncadd [#allocation6], 4294966272  ;;  %v414_v0 = vld [vmem:[#allocation5] sm:$0xff]   ;;  %v415_v1 = vld [vmem:[#allocation5 + $0x8] sm:$0xff]  }
  0x27   :  { %359 = vmatprep.subr.bf16.mxu0 %v414_v0  ;;  %391 = vmatprep.subr.bf16.mxu1 %v414_v0  ;;  %v416_v2 = vld [vmem:[#allocation5 + $0x10] sm:$0xff]   ;;  %v417_v3 = vld [vmem:[#allocation5 + $0x18] sm:$0xff]   ;;  %v422_v4 = vld [vmem:[#allocation2] sm:$0xff]  }
  0x28   :  { %360 = vmatpush3.bf16.msra.mxu0 %v414_v0  ;;  %399 = vmatpush3.bf16.msra.mxu1 %v414_v0  ;;  %v423_v5 = vld [vmem:[#allocation2 + $0x20] sm:$0xff]   ;;  %v419_v7 = vld [vmem:[#allocation5 + $0x28] sm:$0xff]   ;;  %v420_v8 = vld [vmem:[#allocation5 + $0x30] sm:$0xff]  }
  0x29   :  { %361 = vmatprep.subr.bf16.mxu0 %v415_v1  ;;  %392 = vmatprep.subr.bf16.mxu1 %v415_v1  ;;  %v418_v6 = vld [vmem:[#allocation5 + $0x20] sm:$0xff]   ;;  %v421_v9 = vld [vmem:[#allocation5 + $0x38] sm:$0xff]   ;;  %v424_v10 = vld [vmem:[#allocation2 + $0x8] sm:$0xff]  }
  0x2a   :  { %375 = vmatprep.mubr.bf16.mxu0 %v422_v4  ;;  %383 = vmatprep.mubr.bf16.mxu1 %v423_v5  ;;  %v425_v11 = vld [vmem:[#allocation2 + $0x28] sm:$0xff]   ;;  %v426_v12 = vld [vmem:[#allocation2 + $0x10] sm:$0xff]   ;;  %v428_v14 = vld [vmem:[#allocation2 + $0x18] sm:$0xff]  }
  0x2b   :  { %v427_v13 = vld [vmem:[#allocation2 + $0x30] sm:$0xff]   ;;  %v429_v15 = vld [vmem:[#allocation2 + $0x38] sm:$0xff]   ;;  %v326_v16 = vld [vmem:[%s570_s2] ss:$0 sm:$0xff]  ;;  %s506_s2 = smov [#allocation7]  }
  0x2c   :  { %362 = vmatpush3.bf16.msra.mxu0 %v415_v1  ;;  %400 = vmatpush3.bf16.msra.mxu1 %v415_v1  ;;  %s313_s11 = sshll.u32 %s506_s2, 4  ;;  %s314_s11 = int_to_ptr.vmem [resolvable:$true] %s313_s11 }
  0x2d   :  { %363 = vmatprep.subr.bf16.mxu0 %v416_v2  ;;  %393 = vmatprep.subr.bf16.mxu1 %v416_v2  ;;  %s474_s12 = scalar_lea.vmem %s314_s11, 2048  ;;  %p479_p3 = scmp.lt.s32.totalorder %s314_s11, %s314_s11 }
  0x2e   :  { %p475_p2 = scmp.ne.s32.totalorder %s314_s11, %s474_s12  ;;  %p480_p4 = scmp.lt.s32.totalorder %s474_s12, %s474_s12 }
  0x30   :  { %364 = vmatpush3.bf16.msra.mxu0 %v416_v2  ;;  %401 = vmatpush3.bf16.msra.mxu1 %v416_v2  ;;  %p481_p5 = por %p480_p4, %p479_p3 }
  0x31   :  { %365 = vmatprep.subr.bf16.mxu0 %v417_v3  ;;  %394 = vmatprep.subr.bf16.mxu1 %v417_v3 }
  0x32   :  { %p482_p6 = pnand %p481_p5, %p475_p2 }
  0x34   :  { %366 = vmatpush3.bf16.msra.mxu0 %v417_v3  ;;  %402 = vmatpush3.bf16.msra.mxu1 %v417_v3 }
  0x35   :  { %367 = vmatprep.subr.bf16.mxu0 %v418_v6  ;;  %395 = vmatprep.subr.bf16.mxu1 %v418_v6 }
  0x38   :  { %368 = vmatpush3.bf16.msra.mxu0 %v418_v6  ;;  %403 = vmatpush3.bf16.msra.mxu1 %v418_v6 }
  0x39   :  { %369 = vmatprep.subr.bf16.mxu0 %v419_v7  ;;  %396 = vmatprep.subr.bf16.mxu1 %v419_v7 }
  0x3c   :  { %370 = vmatpush3.bf16.msra.mxu0 %v419_v7  ;;  %404 = vmatpush3.bf16.msra.mxu1 %v419_v7 }
  0x3d   :  { %371 = vmatprep.subr.bf16.mxu0 %v420_v8  ;;  %397 = vmatprep.subr.bf16.mxu1 %v420_v8 }
  0x40   :  { %372 = vmatpush3.bf16.msra.mxu0 %v420_v8  ;;  %405 = vmatpush3.bf16.msra.mxu1 %v420_v8 }
  0x41   :  { %373 = vmatprep.subr.bf16.mxu0 %v421_v9  ;;  %398 = vmatprep.subr.bf16.mxu1 %v421_v9 }
  0x44   :  { %374 = vmatpush3.bf16.msra.mxu0 %v421_v9  ;;  %406 = vmatpush3.bf16.msra.mxu1 %v421_v9 }
  0x47   :  { %376 = vmatmul.mubr.bf16.vlgmr.msra.gmra.mrb[0].mxu0 %v424_v10  ;;  %384 = vmatmul.mubr.bf16.vlgmr.msra.gmra.mrb[0].mxu1 %v425_v11 }
  0x48   :  { %379 = vmatprep.mubr.bf16.mxu0 %v426_v12  ;;  %387 = vmatprep.mubr.bf16.mxu1 %v427_v13 }
  0x4f   :  { %380 = vmatmul.mubr.bf16.gmra.mrb[4].mxu0 %v428_v14  ;;  %388 = vmatmul.mubr.bf16.gmra.mrb[4].mxu1 %v429_v15 }
 0x11a   :  { %v377_v17 = vpop.f32.mrb[0].mxu0  ;;  %v385_v18 = vpop.f32.mrb[0].mxu1 }
 0x11b   :  { %v222_v19 = vadd.f32 %v377_v17, %v326_v16  ;;  %v254_v20 = vadd.f32 %v385_v18, %v326_v16  ;;  %v213_v21 = vpop.f32.mrb[1].mxu0  ;;  %v245_v22 = vpop.f32.mrb[1].mxu1 }
 0x11c   :  { %v214_v23 = vadd.f32 %v326_v16, %v213_v21  ;;  %v246_v24 = vadd.f32 %v326_v16, %v245_v22  ;;  %v378_v25 = vpop.f32.mrb[2].mxu0  ;;  %v386_v26 = vpop.f32.mrb[2].mxu1 }
 0x11d   :  { %v278_v27 = vmax.f32 %v222_v19, 0.0  ;;  %v286_v28 = vmax.f32 %v254_v20, 0.0  ;;  %v225_v29 = vadd.f32 %v378_v25, %v326_v16  ;;  %v257_v30 = vadd.f32 %v386_v26, %v326_v16  ;;  %v216_v31 = vpop.f32.mrb[3].mxu0  ;;  %v248_v32 = vpop.f32.mrb[3].mxu1 }
 0x11e   :  { %v276_v33 = vmax.f32 %v214_v23, 0.0  ;;  %v284_v34 = vmax.f32 %v246_v24, 0.0  ;;  %v217_v35 = vadd.f32 %v326_v16, %v216_v31  ;;  %v249_v36 = vadd.f32 %v326_v16, %v248_v32 }
 0x11f   :  { %294 = vst [vmem:[#allocation7 + $0x10] sm:$0xff] %v278_v27  ;;  %302 = vst [vmem:[#allocation7 + $0x50] sm:$0xff] %v286_v28  ;;  %v279_v37 = vmax.f32 %v225_v29, 0.0  ;;  %v287_v38 = vmax.f32 %v257_v30, 0.0 }
 0x120   :  { %292 = vst [vmem:[#allocation7] sm:$0xff] %v276_v33  ;;  %300 = vst [vmem:[#allocation7 + $0x40] sm:$0xff] %v284_v34  ;;  %v277_v39 = vmax.f32 %v217_v35, 0.0  ;;  %v285_v40 = vmax.f32 %v249_v36, 0.0 }
 0x121   :  { %295 = vst [vmem:[#allocation7 + $0x18] sm:$0xff] %v279_v37  ;;  %303 = vst [vmem:[#allocation7 + $0x58] sm:$0xff] %v287_v38 }
 0x122   :  { %293 = vst [vmem:[#allocation7 + $0x8] sm:$0xff] %v277_v39  ;;  %301 = vst [vmem:[#allocation7 + $0x48] sm:$0xff] %v285_v40  ;;  %v381_v41 = vpop.f32.mrb[4].mxu0  ;;  %v389_v42 = vpop.f32.mrb[4].mxu1 }
 0x123   :  { %v238_v43 = vadd.f32 %v381_v41, %v326_v16  ;;  %v270_v44 = vadd.f32 %v389_v42, %v326_v16  ;;  %v229_v45 = vpop.f32.mrb[5].mxu0  ;;  %v261_v46 = vpop.f32.mrb[5].mxu1 }
 0x124   :  { %v230_v47 = vadd.f32 %v326_v16, %v229_v45  ;;  %v262_v48 = vadd.f32 %v326_v16, %v261_v46  ;;  %v382_v49 = vpop.f32.mrb[6].mxu0  ;;  %v390_v50 = vpop.f32.mrb[6].mxu1 }
 0x125   :  { %v282_v51 = vmax.f32 %v238_v43, 0.0  ;;  %v290_v52 = vmax.f32 %v270_v44, 0.0  ;;  %v241_v53 = vadd.f32 %v382_v49, %v326_v16  ;;  %v273_v54 = vadd.f32 %v390_v50, %v326_v16  ;;  %v232_v55 = vpop.f32.mrb[7].mxu0  ;;  %v264_v56 = vpop.f32.mrb[7].mxu1 }
 0x126   :  { %v280_v57 = vmax.f32 %v230_v47, 0.0  ;;  %v288_v58 = vmax.f32 %v262_v48, 0.0  ;;  %v233_v59 = vadd.f32 %v326_v16, %v232_v55  ;;  %v265_v60 = vadd.f32 %v326_v16, %v264_v56 }
 0x127   :  { %298 = vst [vmem:[#allocation7 + $0x30] sm:$0xff] %v282_v51  ;;  %306 = vst [vmem:[#allocation7 + $0x70] sm:$0xff] %v290_v52  ;;  %v283_v61 = vmax.f32 %v241_v53, 0.0  ;;  %v291_v62 = vmax.f32 %v273_v54, 0.0 }
 0x128   :  { %296 = vst [vmem:[#allocation7 + $0x20] sm:$0xff] %v280_v57  ;;  %304 = vst [vmem:[#allocation7 + $0x60] sm:$0xff] %v288_v58  ;;  %v281_v63 = vmax.f32 %v233_v59, 0.0  ;;  %v289_v0 = vmax.f32 %v265_v60, 0.0 }
 0x129   :  { %299 = vst [vmem:[#allocation7 + $0x38] sm:$0xff] %v283_v61  ;;  %307 = vst [vmem:[#allocation7 + $0x78] sm:$0xff] %v291_v62 }
 0x12a   :  { %297 = vst [vmem:[#allocation7 + $0x28] sm:$0xff] %v281_v63  ;;  %305 = vst [vmem:[#allocation7 + $0x68] sm:$0xff] %v289_v0 }
 0x12b   :  { %485 = shalt.err (!%p482_p6)
}
 0x12c   :  { %s486_s15 = scalar_lea.hbm %s571_s3, 2048 }
 0x12d   :  { %p487_p7 = scmp.ne.s32.totalorder %s571_s3, %s486_s15  ;;  %p490_p8 = scmp.lt.u32.totalorder %s486_s15, %s571_s3 }
 0x12f   :  { %p492_p9 = pnand %p490_p8, %p487_p7 }
 0x131   :  { %495 = shalt.err (!%p492_p9)
}
 0x132   :  { %s507_s20 = smov 128   ;;  %s508_s21 = smov 8  }
 0x133   :  { %319 = dma.vmem_to_hbm [thread:$0]  %s314_s11, 2048, %s571_s3, [#allocation4], %s507_s20, %s507_s20, %s508_s21  }
 0x134   :  { %500 = dma.done.wait [#allocation4], 2048  }
 0x135   :  { %501 = vsyncadd [#allocation4], 4294965248 }
 0x136   :  { %323 = vsyncpa [#allocation3], 1 }
 0x137   :  { %324 = vsyncpa [#allocation6], 1 }
 0x138   :  { %325 = vsyncpa [#allocation4], 1 }

</bundles_post_ra>
